<compile_context>
chip_gen: v6e
topology: v6e:2x2x1
jax: 0.10.0
libtpu: 0.0.40
codegen_flags: <defaults>
</compile_context>

<pallas_src>
import jax
import jax.numpy as jnp
from jax.experimental import pallas as pl
from jax.experimental.pallas import tpu as pltpu

_MIN_PIPELINE_STEPS = 8  # target >= 8 grid steps for DMA/compute overlap + v7x 2-TC sharding


def _round_up(n, m):
    return ((n + m - 1) // m) * m


def _target_block_bytes():
    # 2 MiB blocks (x 2 in-bufs + 2 out-bufs = 8 MiB) fit every generation's scoped-VMEM
    # default.  v7x (3.2 TB/s HBM, 32 MiB scoped / 64 MiB physical) amortizes per-step
    # overhead better with 4 MiB blocks; keep 2 MiB on v5e/v6e.
    try:
        name = str(pltpu.get_tpu_info().chip_version).lower()
        if "7" in name:
            return 4 * 1024 * 1024
    except Exception:
        pass
    return 2 * 1024 * 1024


def _affine_kernel(params_ref, x_ref, o_ref):
    # params_ref lives in SMEM: [slope, intercept]; scalar loads are free for a
    # DMA-bound kernel and avoid a recompile per distinct (slope, intercept).
    s = params_ref[0]
    b = params_ref[1]
    x = x_ref[...]
    # Compute in f32 (matches PyTorch float-scalar * tensor semantics); the cast is a
    # no-op for f32 inputs.  NOTE: for integer inputs the store truncates back to the
    # integer dtype, whereas PyTorch would promote to float.
    o_ref[...] = (x.astype(jnp.float32) * s + b).astype(o_ref.dtype)


def linear_forward(x, slope=1.0, intercept=0.0):
    """y = slope * x + intercept via a tiled, pipelined Pallas TPU kernel (no pad/slice passes)."""
    orig_shape = x.shape
    dtype = x.dtype
    total = int(x.size)
    itemsize = jnp.dtype(dtype).itemsize
    sub = max(8, 32 // itemsize)          # sublane packing: 8 (f32), 16 (bf16), 32 (int8/fp8)
    block_bytes = _target_block_bytes()

    params = jnp.asarray([slope, intercept], dtype=jnp.float32)

    # ---- pad-free, lane-dense 2D view (reshape is free; no jnp.pad, no output slice) ----
    rows, lanes = 1, total
    for cand in (1024, 512, 256, 128):
        if total % cand == 0:
            rows, lanes = total // cand, cand
            break

    if rows == 1:
        # Ragged fallback (element count not a multiple of 128): single-row slab tiled
        # along lanes; Pallas masks the partial final block, so still no pad / slice.
        tile_lanes_cap = max(128, (block_bytes // itemsize) // 128 * 128)
        if total <= tile_lanes_cap:
            block = (1, total)            # full-extent block (allowed for any size)
            grid = (1,)
        else:
            block = (1, tile_lanes_cap)
            grid = (pl.cdiv(total, tile_lanes_cap),)
        index_map = lambda i: (0, i)
    else:
        # Main path: (rows, lanes) slab, lanes in {128..1024} -> every store is lane-dense.
        if rows <= sub:
            tile_rows = rows              # full-extent block on the sublane dim
        else:
            max_rows_by_bytes = max(sub, (block_bytes // (lanes * itemsize)) // sub * sub)
            rows_for_steps = _round_up(pl.cdiv(rows, _MIN_PIPELINE_STEPS), sub)
            tile_rows = max(sub, min(max_rows_by_bytes, rows_for_steps))
        block = (tile_rows, lanes)
        grid = (pl.cdiv(rows, tile_rows),)   # exact rows; partial last block handled by Pallas
        index_map = lambda i: (i, 0)

    x2d = x.reshape(rows, lanes)

    out2d = pl.pallas_call(
        _affine_kernel,
        out_shape=jax.ShapeDtypeStruct((rows, lanes), dtype),
        grid=grid,
        in_specs=[
            pl.BlockSpec(memory_space=pltpu.MemorySpace.SMEM),  # [slope, intercept]
            pl.BlockSpec(block, index_map),
        ],
        out_specs=pl.BlockSpec(block, index_map),
        compiler_params=pltpu.CompilerParams(
            dimension_semantics=("parallel",),  # shards row tiles across v7x's 2 TCs
        ),
    )(params, x2d)

    return out2d.reshape(orig_shape)


if __name__ == "__main__":
    key = jax.random.PRNGKey(0)
    # Small NCHW input, consistent with a generic elementwise module.
    x = jax.random.normal(key, (2, 4, 16, 16), dtype=jnp.float32)

    slope, intercept = 2.5, -1.25

    y = linear_forward(x, slope=slope, intercept=intercept)
    y = jax.block_until_ready(y)

    # Correctness check against the reference semantics.
    y_ref = slope * x + intercept
    assert y.shape == x.shape and y.dtype == x.dtype
    assert jnp.allclose(y, y_ref, atol=1e-6, rtol=1e-6)

    print("KERNEL_OK")
</pallas_src>

<mosaic_0001>
module attributes {stable_mosaic.version = 11 : i64} {
  func.func @_affine_kernel(%arg0: i32, %arg1: memref<2xf32, #tpu.memory_space<smem>>, %arg2: memref<2x1024xf32, #tpu.memory_space<vmem>>, %arg3: memref<2x1024xf32, #tpu.memory_space<vmem>>) attributes {dimension_semantics = [#tpu.dimension_semantics<parallel>], iteration_bounds = array<i64: 1>, scalar_prefetch = 0 : i64, scratch_operands = 0 : i64, tpu.core_type = #tpu.core_type<tc>, window_params = [{transform_indices = @transform_0, window_bounds = array<i64: 2>}, {transform_indices = @transform_1, window_bounds = array<i64: 2, 1024>}, {transform_indices = @transform_2, window_bounds = array<i64: 2, 1024>}]} {
    %c0 = arith.constant 0 : index
    %0 = memref.load %arg1[%c0] : memref<2xf32, #tpu.memory_space<smem>>
    %c1 = arith.constant 1 : index
    %1 = memref.load %arg1[%c1] : memref<2xf32, #tpu.memory_space<smem>>
    %c0_0 = arith.constant 0 : index
    %c0_1 = arith.constant 0 : index
    %2 = vector.load %arg2[%c0_0, %c0_1] : memref<2x1024xf32, #tpu.memory_space<vmem>>, vector<2x1024xf32>
    %3 = vector.broadcast %0 : f32 to vector<2x1024xf32>
    %4 = arith.mulf %2, %3 : vector<2x1024xf32>
    %5 = vector.broadcast %1 : f32 to vector<2x1024xf32>
    %6 = arith.addf %4, %5 : vector<2x1024xf32>
    %c0_2 = arith.constant 0 : index
    %c0_3 = arith.constant 0 : index
    %7 = vector.load %arg3[%c0_2, %c0_3] : memref<2x1024xf32, #tpu.memory_space<vmem>>, vector<2x1024xf32>
    tpu.vector_store %arg3[%c0_2, %c0_3], %6 {strides = array<i32>} : memref<2x1024xf32, #tpu.memory_space<vmem>>, vector<2x1024xf32>,
    return
  }
  func.func @transform_0(%arg0: i32) -> i32 {
    %c0_i32 = arith.constant 0 : i32
    %c0_i32_0 = arith.constant 0 : i32
    return %c0_i32 : i32
  }
  func.func @transform_1(%arg0: i32) -> (i32, i32) {
    %c0_i32 = arith.constant 0 : i32
    %c0_i32_0 = arith.constant 0 : i32
    return %arg0, %c0_i32 : i32, i32
  }
  func.func @transform_2(%arg0: i32) -> (i32, i32) {
    %c0_i32 = arith.constant 0 : i32
    %c0_i32_0 = arith.constant 0 : i32
    return %arg0, %c0_i32 : i32, i32
  }
}

</mosaic_0001>

<bundles_post_ra>
// kernel: tpu_custom_call.1
= control target key start
LH: loop header
LB: loop body
LE: loop exit
PB: predicated region body
PF: predicated region fallthrough
CT: control target
= control target key end

     0   :  { %7 = vsyncpa [#allocation5], 0  ;;  %s148_s0 = inlined_call_operand.hbm [shape: f32[2], index: 0, kind: input, shape index: {}]   ;;  %s149_s1 = inlined_call_operand.hbm [shape: f32[2,1024], index: 1, kind: input, shape index: {}]   ;;  %s150_s2 = inlined_call_operand.hbm [shape: f32[2,1024], index: 2, kind: output, shape index: {}]  }
   0x1   :  { %8 = vsyncpa [#allocation3], 0 }
   0x2   :  { %9 = vsyncpa [#allocation4], 0  ;;  %s121_s9 = smov [#allocation2]   ;;  %s122_s12 = smov [#allocation6]  }
   0x3   :  { %17 = dma.hbm_to_smem %s148_s0, 16, %s121_s9, [#allocation5]  }
   0x4   :  { %s24_s13 = sshll.u32 %s122_s12, 4  ;;  %s25_s13 = int_to_ptr.vmem [resolvable:$true] %s24_s13 }
   0x5   :  { %s83_s14 = scalar_lea.vmem %s25_s13, 256  ;;  %p88_p1 = scmp.lt.s32.totalorder %s25_s13, %s25_s13 }
   0x6   :  { %p84_p0 = scmp.ne.s32.totalorder %s25_s13, %s83_s14  ;;  %p89_p2 = scmp.lt.s32.totalorder %s83_s14, %s83_s14 }
   0x8   :  { %p90_p3 = por %p89_p2, %p88_p1 }
   0xa   :  { %p91_p4 = pnand %p90_p3, %p84_p0 }
   0xc   :  { %94 = shalt.err (!%p91_p4)
}
   0xd   :  { %27 = dma.hbm_to_vmem [thread:$0]  %s149_s1, 256, %s25_s13, [#allocation3]  }
   0xe   :  { %115 = dma.done.wait [#allocation5], 16  }
   0xf   :  { %116 = vsyncadd [#allocation5], 4294967280 }
  0x10   :  { %117 = dma.done.wait [#allocation3], 256  }
  0x11   :  { %118 = vsyncadd [#allocation3], 4294967040 }
  0x12   :  { %34 = sfence }
  0x13   :  { %s35_s0 = sld [smem:[#allocation2]]  ;;  %v37_v0 = vld [vmem:[#allocation6] sm:$0xff]  ;;  %v38_v1 = vld [vmem:[#allocation6 + $0x8] sm:$0xff]  ;;  %s123_s18 = smov [#allocation7]  }
  0x14   :  { %s63_s17 = sld [smem:[#allocation2 + $0x1]]  ;;  %s53_s19 = sshll.u32 %s123_s18, 4  ;;  %s54_s19 = int_to_ptr.vmem [resolvable:$true] %s53_s19 }
  0x15   :  { %s95_s1 = scalar_lea.vmem %s54_s19, 256  ;;  %p100_p6 = scmp.lt.s32.totalorder %s54_s19, %s54_s19 }
  0x16   :  { %p96_p5 = scmp.ne.s32.totalorder %s54_s19, %s95_s1  ;;  %p101_p7 = scmp.lt.s32.totalorder %s95_s1, %s95_s1 }
  0x18   :  { %p102_p8 = por %p101_p7, %p100_p6 }
  0x19   :  { %v39_v2 = vstv %s35_s0 }
  0x1a   :  { %v40_v3 = vmul.f32 %v39_v2, %v37_v0  ;;  %v42_v4 = vstv %s63_s17  ;;  %v41_v5 = vmul.f32 %v39_v2, %v38_v1  ;;  %p103_p9 = pnand %p102_p8, %p96_p5 }
  0x1c   :  { %v43_v6 = vadd.f32 %v42_v4, %v40_v3  ;;  %v44_v7 = vadd.f32 %v42_v4, %v41_v5 }
  0x1e   :  { %45 = vst [vmem:[#allocation7] sm:$0xff] %v43_v6  ;;  %46 = vst [vmem:[#allocation7 + $0x8] sm:$0xff] %v44_v7 }
  0x1f   :  { %106 = shalt.err (!%p103_p9)
}
  0x20   :  { %56 = dma.vmem_to_hbm [thread:$0]  %s54_s19, 256, %s150_s2, [#allocation4]  }
  0x21   :  { %119 = dma.done.wait [#allocation4], 256  }
  0x22   :  { %120 = vsyncadd [#allocation4], 4294967040 }
  0x23   :  { %60 = vsyncpa [#allocation3], 1 }
  0x24   :  { %61 = vsyncpa [#allocation4], 1 }
  0x25   :  { %62 = vsyncpa [#allocation5], 1 }

</bundles_post_ra>
